<compile_context>
chip_gen: v6e
topology: v6e:2x2x1
jax: 0.10.0
libtpu: 0.0.40
codegen_flags: <defaults>
</compile_context>

<pallas_src>
import functools

import jax
import jax.numpy as jnp
from jax import lax
from jax.experimental import pallas as pl
from jax.experimental.pallas import tpu as pltpu


def _round_up(x, m):
    return ((x + m - 1) // m) * m


def _matmul_bias_relu_kernel(lhs_ref, w_ref, b_ref, o_ref):
    """One M-tile per grid step: out = relu(lhs @ w + b) -- single MXU matmul.

    lhs_ref: (TM, Kc)     packed im2col rows
    w_ref:   (Kc, CoutL)  packed weights (block-diagonal when pixel-packing)
    b_ref:   (1, CoutL)   packed bias
    o_ref:   (TM, CoutL)  lane-dense output (full 128-lane stores)
    """
    acc = jnp.dot(lhs_ref[...], w_ref[...], preferred_element_type=jnp.float32)
    y = acc + b_ref[...]
    o_ref[...] = jnp.maximum(y, 0.0).astype(o_ref.dtype)


def _vmem_limit_bytes():
    # v5e/v6e: 128 MiB physical VMEM -> allow up to ~96 MiB scoped;
    # v7x:     64 MiB physical       -> cap at ~48 MiB.
    try:
        cap = pltpu.get_tpu_info().vmem_capacity_bytes
    except Exception:
        cap = 64 * 1024 * 1024
    return int(max(32 * 1024 * 1024,
                   min(cap - 16 * 1024 * 1024, 96 * 1024 * 1024)))


@functools.partial(jax.jit, static_argnames=("ksize", "stride", "pad"))
def conv_block_forward(x_nchw, weight, bias, *, ksize=3, stride=1, pad=1):
    """ConvBlock forward: Conv2d(ksize, stride, pad, bias) + ReLU.

    x: (N, Cin, H, W) float32 (PyTorch NCHW)
    weight: (Cout, Cin, KH, KW), bias: (Cout,)
    """
    N, Cin, H, W = x_nchw.shape
    Cout = weight.shape[0]
    K = ksize
    Ho = (H + 2 * pad - K) // stride + 1
    Wo = (W + 2 * pad - K) // stride + 1
    M = N * Ho * Wo
    KKC = K * K * Cin

    # ---- wrapper glue: NCHW -> NHWC, spatial zero-pad, im2col patch matrix ----
    x_nhwc = jnp.transpose(x_nchw, (0, 2, 3, 1))
    xp = jnp.pad(x_nhwc, ((0, 0), (pad, pad), (pad, pad), (0, 0)))
    taps = []
    for kh in range(K):
        for kw in range(K):
            taps.append(xp[:, kh:kh + stride * (Ho - 1) + 1:stride,
                            kw:kw + stride * (Wo - 1) + 1:stride, :])
    # per-pixel feature order = (kh, kw, cin)
    lhs = jnp.concatenate(taps, axis=-1).reshape(M, KKC)

    # weights -> (K*K*Cin, Cout) in the same (kh, kw, cin) order
    w2 = jnp.transpose(weight, (2, 3, 1, 0)).reshape(KKC, Cout)

    # ---- output-lane packing: G pixels x Cout channels per 128-lane row ----
    if Cout < 128 and 128 % Cout == 0 and M % (128 // Cout) == 0:
        G = 128 // Cout                 # e.g. Cout=8 -> 16 pixels per lane row
    else:
        G = 1                           # fallback: plain Cout padding to 128
    Kc = G * KKC
    CoutL = _round_up(G * Cout, 128)    # lane-dense output width (128 when packed)

    Mg = M // G
    lhs_g = lhs.reshape(Mg, Kc)         # free: row-major contiguous regroup

    # block-diagonal packed weight (G*KKC, G*Cout); reduces to w2 when G == 1
    eye_g = jnp.eye(G, dtype=w2.dtype)
    w_pack = jnp.einsum("gh,kc->gkhc", eye_g, w2).reshape(Kc, G * Cout)
    w_pack = jnp.pad(w_pack, ((0, 0), (0, CoutL - G * Cout)))
    b_pack = jnp.pad(jnp.tile(bias, (G,)), ((0, CoutL - G * Cout),)).reshape(1, CoutL)

    # ---- M-row tiling: batches all images, independent tiles -> "parallel" ----
    TM = min(512, _round_up(Mg, 8))
    Mp = _round_up(Mg, TM)
    if Mp != Mg:
        lhs_g = jnp.pad(lhs_g, ((0, Mp - Mg), (0, 0)))

    flops = 2 * Mp * Kc * CoutL
    bytes_accessed = (Mp * Kc + Kc * CoutL + CoutL + Mp * CoutL) * 4

    out = pl.pallas_call(
        _matmul_bias_relu_kernel,
        out_shape=jax.ShapeDtypeStruct((Mp, CoutL), x_nchw.dtype),
        grid=(Mp // TM,),
        in_specs=[
            pl.BlockSpec((TM, Kc), lambda m: (m, 0)),
            # TODO(synk): weight/bias index_maps are constant; pipeline_mode=pl.Buffered(1)
            #             would drop their second VMEM buffer once Cin/Cout grow.
            pl.BlockSpec((Kc, CoutL), lambda m: (0, 0)),
            pl.BlockSpec((1, CoutL), lambda m: (0, 0)),
        ],
        out_specs=pl.BlockSpec((TM, CoutL), lambda m: (m, 0)),
        compiler_params=pltpu.CompilerParams(
            dimension_semantics=("parallel",),          # megacore over M tiles
            vmem_limit_bytes=_vmem_limit_bytes(),
        ),
        cost_estimate=pl.CostEstimate(
            flops=flops, transcendentals=0, bytes_accessed=bytes_accessed),
    )(lhs_g, w_pack, b_pack)

    # unpack: (Mp, CoutL) -> (M, Cout) -> (N, Ho, Wo, Cout) -> NCHW
    out = out[:Mg, :G * Cout].reshape(M, Cout).reshape(N, Ho, Wo, Cout)
    return jnp.transpose(out, (0, 3, 1, 2))


def _reference_conv_relu(x_nchw, weight, bias, stride, pad):
    y = lax.conv_general_dilated(
        x_nchw, weight,
        window_strides=(stride, stride),
        padding=((pad, pad), (pad, pad)),
        dimension_numbers=("NCHW", "OIHW", "NCHW"))
    y = y + bias.reshape(1, -1, 1, 1)
    return jnp.maximum(y, 0.0)


if __name__ == "__main__":
    # ConvBlock(in_chan=4, out_chan=8) on a small deterministic input.
    key = jax.random.PRNGKey(0)
    k_x, k_w, k_b = jax.random.split(key, 3)

    N, Cin, H, W = 2, 4, 16, 16
    Cout, ksize, stride, pad = 8, 3, 1, 1

    x = jax.random.normal(k_x, (N, Cin, H, W), dtype=jnp.float32)
    weight = jax.random.normal(k_w, (Cout, Cin, ksize, ksize), dtype=jnp.float32) * 0.1
    bias = jax.random.normal(k_b, (Cout,), dtype=jnp.float32) * 0.1

    y = conv_block_forward(x, weight, bias, ksize=ksize, stride=stride, pad=pad)
    y = jax.block_until_ready(y)

    y_ref = _reference_conv_relu(x, weight, bias, stride, pad)
    assert y.shape == (N, Cout, H, W), y.shape
    assert jnp.allclose(y, y_ref, atol=1e-4, rtol=1e-4), "mismatch vs reference conv"

    print("KERNEL_OK")
</pallas_src>

<mosaic_0001>
module attributes {stable_mosaic.version = 11 : i64} {
  func.func @_matmul_bias_relu_kernel(%arg0: i32, %arg1: memref<32x576xf32, #tpu.memory_space<vmem>>, %arg2: memref<576x128xf32, #tpu.memory_space<vmem>>, %arg3: memref<1x128xf32, #tpu.memory_space<vmem>>, %arg4: memref<32x128xf32, #tpu.memory_space<vmem>>) attributes {dimension_semantics = [#tpu.dimension_semantics<parallel>], iteration_bounds = array<i64: 1>, scalar_prefetch = 0 : i64, scratch_operands = 0 : i64, tpu.core_type = #tpu.core_type<tc>, window_params = [{transform_indices = @transform_0, window_bounds = array<i64: 32, 576>}, {pipeline_mode = #tpu.pipeline_mode<synchronous>, transform_indices = @transform_1, window_bounds = array<i64: 576, 128>}, {pipeline_mode = #tpu.pipeline_mode<synchronous>, transform_indices = @transform_2, window_bounds = array<i64: 1, 128>}, {transform_indices = @transform_3, window_bounds = array<i64: 32, 128>}]} {
    %c0 = arith.constant 0 : index
    %c0_0 = arith.constant 0 : index
    %0 = vector.load %arg1[%c0, %c0_0] : memref<32x576xf32, #tpu.memory_space<vmem>>, vector<32x576xf32>
    %c0_1 = arith.constant 0 : index
    %c0_2 = arith.constant 0 : index
    %1 = vector.load %arg2[%c0_1, %c0_2] : memref<576x128xf32, #tpu.memory_space<vmem>>, vector<576x128xf32>
    %cst = arith.constant dense<0.000000e+00> : vector<32x128xf32>
    %2 = tpu.matmul %0, %1, %cst {dimension_numbers = #tpu.dot_dimension_numbers<[1], [0], [0], [1], [0, 0, 1, 1], [], []>} : vector<32x576xf32>, vector<576x128xf32>, vector<32x128xf32> -> vector<32x128xf32>
    %c0_3 = arith.constant 0 : index
    %c0_4 = arith.constant 0 : index
    %3 = vector.load %arg3[%c0_3, %c0_4] : memref<1x128xf32, #tpu.memory_space<vmem>>, vector<1x128xf32>
    %4 = vector.broadcast %3 : vector<1x128xf32> to vector<32x128xf32>
    %5 = arith.addf %2, %4 : vector<32x128xf32>
    %cst_5 = arith.constant 0.000000e+00 : f32
    %6 = vector.broadcast %cst_5 : f32 to vector<32x128xf32>
    %7 = arith.maximumf %5, %6 : vector<32x128xf32>
    %c0_6 = arith.constant 0 : index
    %c0_7 = arith.constant 0 : index
    %8 = vector.load %arg4[%c0_6, %c0_7] : memref<32x128xf32, #tpu.memory_space<vmem>>, vector<32x128xf32>
    tpu.vector_store %arg4[%c0_6, %c0_7], %7 {strides = array<i32>} : memref<32x128xf32, #tpu.memory_space<vmem>>, vector<32x128xf32>,
    return
  }
  func.func @transform_0(%arg0: i32) -> (i32, i32) {
    %c0_i32 = arith.constant 0 : i32
    %c0_i32_0 = arith.constant 0 : i32
    return %arg0, %c0_i32 : i32, i32
  }
  func.func @transform_1(%arg0: i32) -> (i32, i32) {
    %c0_i32 = arith.constant 0 : i32
    %c0_i32_0 = arith.constant 0 : i32
    %c0_i32_1 = arith.constant 0 : i32
    return %c0_i32, %c0_i32_0 : i32, i32
  }
  func.func @transform_2(%arg0: i32) -> (i32, i32) {
    %c0_i32 = arith.constant 0 : i32
    %c0_i32_0 = arith.constant 0 : i32
    %c0_i32_1 = arith.constant 0 : i32
    return %c0_i32, %c0_i32_0 : i32, i32
  }
  func.func @transform_3(%arg0: i32) -> (i32, i32) {
    %c0_i32 = arith.constant 0 : i32
    %c0_i32_0 = arith.constant 0 : i32
    return %arg0, %c0_i32 : i32, i32
  }
}

</mosaic_0001>

<bundles_post_ra>
// kernel: tile.8
= control target key start
LH: loop header
LB: loop body
LE: loop exit
PB: predicated region body
PF: predicated region fallthrough
CT: control target
= control target key end

     0   :  { %s28_s0 = inlined_call_operand.vmem [shape: f32[8], index: 0, kind: input, shape index: {}]   ;;  %s29_s1 = inlined_call_operand.vmem [shape: f32[16,8], index: 1, kind: output, shape index: {}]  }
   0x1   :  { %v4_v0 = vld [vmem:[%s28_s0] ss:$0 sm:$0xff] }
   0x2   :  { %5 = vst [vmem:[%s29_s1] sm:$0xff] %v4_v0  ;;  %8 = vst [vmem:[%s29_s1 + $0x8] sm:$0xff] %v4_v0 }

// kernel: conv_block_forward.1
= control target key start
LH: loop header
LB: loop body
LE: loop exit
PB: predicated region body
PF: predicated region fallthrough
CT: control target
= control target key end

     0   :  { %vm113_vm0 = vcmask 523264   ;;  %s847_s1 = inlined_call_operand.vmem [shape: f32[576,128], index: 1, kind: input, shape index: {}]   ;;  %s848_s0 = inlined_call_operand.vmem [shape: f32[32,576], index: 0, kind: input, shape index: {}]   ;;  %s849_s2 = inlined_call_operand.vmem [shape: f32[1,128], index: 2, kind: input, shape index: {}]   ;;  %s850_s3 = inlined_call_operand.vmem [shape: f32[32,128], index: 3, kind: output, shape index: {}]  }
   0x1   :  { %v65_v0 = vld [vmem:[%s847_s1 + $0xf8] sm:$0xff]  ;;  %v64_v4 = vld [vmem:[%s847_s1 + $0xf0] sm:$0xff]  ;;  %v63_v8 = vld [vmem:[%s847_s1 + $0xe8] sm:$0xff] }
   0x2   :  { %v97_v1 = vld [vmem:[%s847_s1 + $0x1f8] sm:$0xff]  ;;  %398 = vmatprep.subr.mxu0 %v65_v0  ;;  %v96_v5 = vld [vmem:[%s847_s1 + $0x1f0] sm:$0xff]  ;;  %v95_v9 = vld [vmem:[%s847_s1 + $0x1e8] sm:$0xff] }
   0x3   :  { %v49_v2 = vld [vmem:[%s847_s1 + $0x78] sm:$0xff]  ;;  %442 = vmatprep.subr.mxu1 %v97_v1  ;;  %v48_v6 = vld [vmem:[%s847_s1 + $0x70] sm:$0xff]  ;;  %v47_v10 = vld [vmem:[%s847_s1 + $0x68] sm:$0xff] }
   0x4   :  { %v81_v3 = vld [vmem:[%s847_s1 + $0x178] sm:$0xff]  ;;  %399 = vmatpush3.msra.mxu0 %v49_v2  ;;  %v80_v7 = vld [vmem:[%s847_s1 + $0x170] sm:$0xff]  ;;  %v79_v11 = vld [vmem:[%s847_s1 + $0x168] sm:$0xff] }
   0x5   :  { %443 = vmatpush3.msra.mxu1 %v81_v3  ;;  %400 = vmatprep.subr.mxu0 %v64_v4  ;;  %v62_v12 = vld [vmem:[%s847_s1 + $0xe0] sm:$0xff]  ;;  %v61_v16 = vld [vmem:[%s847_s1 + $0xd8] sm:$0xff]  ;;  %v60_v20 = vld [vmem:[%s847_s1 + $0xd0] sm:$0xff] }
   0x6   :  { %444 = vmatprep.subr.mxu1 %v96_v5  ;;  %401 = vmatpush3.msra.mxu0 %v48_v6  ;;  %v94_v13 = vld [vmem:[%s847_s1 + $0x1e0] sm:$0xff]  ;;  %v93_v17 = vld [vmem:[%s847_s1 + $0x1d8] sm:$0xff]  ;;  %v92_v21 = vld [vmem:[%s847_s1 + $0x1d0] sm:$0xff] }
   0x7   :  { %445 = vmatpush3.msra.mxu1 %v80_v7  ;;  %402 = vmatprep.subr.mxu0 %v63_v8  ;;  %v46_v14 = vld [vmem:[%s847_s1 + $0x60] sm:$0xff]  ;;  %v45_v18 = vld [vmem:[%s847_s1 + $0x58] sm:$0xff]  ;;  %v44_v22 = vld [vmem:[%s847_s1 + $0x50] sm:$0xff] }
   0x8   :  { %446 = vmatprep.subr.mxu1 %v95_v9  ;;  %v78_v15 = vld [vmem:[%s847_s1 + $0x160] sm:$0xff]  ;;  %403 = vmatpush3.msra.mxu0 %v47_v10  ;;  %v77_v19 = vld [vmem:[%s847_s1 + $0x158] sm:$0xff]  ;;  %v76_v23 = vld [vmem:[%s847_s1 + $0x150] sm:$0xff] }
   0x9   :  { %447 = vmatpush3.msra.mxu1 %v79_v11  ;;  %404 = vmatprep.subr.mxu0 %v62_v12  ;;  %v59_v24 = vld [vmem:[%s847_s1 + $0xc8] sm:$0xff]  ;;  %v58_v28 = vld [vmem:[%s847_s1 + $0xc0] sm:$0xff]  ;;  %v57_v32 = vld [vmem:[%s847_s1 + $0xb8] sm:$0xff] }
   0xa   :  { %448 = vmatprep.subr.mxu1 %v94_v13  ;;  %405 = vmatpush3.msra.mxu0 %v46_v14  ;;  %v91_v25 = vld [vmem:[%s847_s1 + $0x1c8] sm:$0xff]  ;;  %v90_v29 = vld [vmem:[%s847_s1 + $0x1c0] sm:$0xff]  ;;  %v89_v33 = vld [vmem:[%s847_s1 + $0x1b8] sm:$0xff] }
   0xb   :  { %449 = vmatpush3.msra.mxu1 %v78_v15  ;;  %406 = vmatprep.subr.mxu0 %v61_v16  ;;  %v43_v26 = vld [vmem:[%s847_s1 + $0x48] sm:$0xff]  ;;  %v42_v30 = vld [vmem:[%s847_s1 + $0x40] sm:$0xff]  ;;  %v41_v34 = vld [vmem:[%s847_s1 + $0x38] sm:$0xff] }
   0xc   :  { %450 = vmatprep.subr.mxu1 %v93_v17  ;;  %407 = vmatpush3.msra.mxu0 %v45_v18  ;;  %v75_v27 = vld [vmem:[%s847_s1 + $0x148] sm:$0xff]  ;;  %v74_v31 = vld [vmem:[%s847_s1 + $0x140] sm:$0xff]  ;;  %v73_v35 = vld [vmem:[%s847_s1 + $0x138] sm:$0xff] }
   0xd   :  { %451 = vmatpush3.msra.mxu1 %v77_v19  ;;  %408 = vmatprep.subr.mxu0 %v60_v20  ;;  %v56_v36 = vld [vmem:[%s847_s1 + $0xb0] sm:$0xff]  ;;  %v55_v40 = vld [vmem:[%s847_s1 + $0xa8] sm:$0xff]  ;;  %v54_v44 = vld [vmem:[%s847_s1 + $0xa0] sm:$0xff] }
   0xe   :  { %452 = vmatprep.subr.mxu1 %v92_v21  ;;  %409 = vmatpush3.msra.mxu0 %v44_v22  ;;  %v88_v37 = vld [vmem:[%s847_s1 + $0x1b0] sm:$0xff]  ;;  %v87_v41 = vld [vmem:[%s847_s1 + $0x1a8] sm:$0xff]  ;;  %v86_v45 = vld [vmem:[%s847_s1 + $0x1a0] sm:$0xff] }
   0xf   :  { %453 = vmatpush3.msra.mxu1 %v76_v23  ;;  %410 = vmatprep.subr.mxu0 %v59_v24  ;;  %v40_v38 = vld [vmem:[%s847_s1 + $0x30] sm:$0xff]  ;;  %v39_v42 = vld [vmem:[%s847_s1 + $0x28] sm:$0xff]  ;;  %v38_v46 = vld [vmem:[%s847_s1 + $0x20] sm:$0xff] }
  0x10   :  { %454 = vmatprep.subr.mxu1 %v91_v25  ;;  %411 = vmatpush3.msra.mxu0 %v43_v26  ;;  %v72_v39 = vld [vmem:[%s847_s1 + $0x130] sm:$0xff]  ;;  %v71_v43 = vld [vmem:[%s847_s1 + $0x128] sm:$0xff]  ;;  %v70_v47 = vld [vmem:[%s847_s1 + $0x120] sm:$0xff] }
  0x11   :  { %455 = vmatpush3.msra.mxu1 %v75_v27  ;;  %412 = vmatprep.subr.mxu0 %v58_v28  ;;  %v53_v48 = vld [vmem:[%s847_s1 + $0x98] sm:$0xff]  ;;  %v52_v52 = vld [vmem:[%s847_s1 + $0x90] sm:$0xff]  ;;  %v51_v56 = vld [vmem:[%s847_s1 + $0x88] sm:$0xff] }
  0x12   :  { %456 = vmatprep.subr.mxu1 %v90_v29  ;;  %413 = vmatpush3.msra.mxu0 %v42_v30  ;;  %v85_v49 = vld [vmem:[%s847_s1 + $0x198] sm:$0xff]  ;;  %v84_v53 = vld [vmem:[%s847_s1 + $0x190] sm:$0xff]  ;;  %v83_v57 = vld [vmem:[%s847_s1 + $0x188] sm:$0xff] }
  0x13   :  { %457 = vmatpush3.msra.mxu1 %v74_v31  ;;  %414 = vmatprep.subr.mxu0 %v57_v32  ;;  %v37_v50 = vld [vmem:[%s847_s1 + $0x18] sm:$0xff]  ;;  %v36_v54 = vld [vmem:[%s847_s1 + $0x10] sm:$0xff]  ;;  %v35_v58 = vld [vmem:[%s847_s1 + $0x8] sm:$0xff] }
  0x14   :  { %458 = vmatprep.subr.mxu1 %v89_v33  ;;  %415 = vmatpush3.msra.mxu0 %v41_v34  ;;  %v69_v51 = vld [vmem:[%s847_s1 + $0x118] sm:$0xff]  ;;  %v68_v55 = vld [vmem:[%s847_s1 + $0x110] sm:$0xff]  ;;  %v67_v59 = vld [vmem:[%s847_s1 + $0x108] sm:$0xff] }
  0x15   :  { %459 = vmatpush3.msra.mxu1 %v73_v35  ;;  %416 = vmatprep.subr.mxu0 %v56_v36  ;;  %v50_v60 = vld [vmem:[%s847_s1 + $0x80] sm:$0xff]  ;;  %v15_v63 = vld [vmem:[%s848_s0 + $0x8] sm:$0xff]  ;;  %v17_v1 = vld [vmem:[%s848_s0 + $0x18] sm:$0xff] }
  0x16   :  { %460 = vmatprep.subr.mxu1 %v88_v37  ;;  %417 = vmatpush3.msra.mxu0 %v40_v38  ;;  %v82_v61 = vld [vmem:[%s847_s1 + $0x180] sm:$0xff]  ;;  %v16_v3 = vld [vmem:[%s848_s0 + $0x10] sm:$0xff]  ;;  %v105_v4 = vld [vmem:[%s847_s1 + $0x238] sm:$0xff] }
  0x17   :  { %461 = vmatpush3.msra.mxu1 %v72_v39  ;;  %418 = vmatprep.subr.mxu0 %v55_v40  ;;  %v34_v62 = vld [vmem:[%s847_s1] sm:$0xff]  ;;  %v104_v5 = vld [vmem:[%s847_s1 + $0x230] sm:$0xff]  ;;  %v19_v8 = vld [vmem:[%s848_s0 + $0x28] sm:$0xff] }
  0x18   :  { %462 = vmatprep.subr.mxu1 %v87_v41  ;;  %419 = vmatpush3.msra.mxu0 %v39_v42  ;;  %v66_v0 = vld [vmem:[%s847_s1 + $0x100] sm:$0xff]  ;;  %v20_v6 = vld [vmem:[%s848_s0 + $0x30] sm:$0xff]  ;;  %v21_v9 = vld [vmem:[%s848_s0 + $0x38] sm:$0xff] }
  0x19   :  { %463 = vmatpush3.msra.mxu1 %v71_v43  ;;  %420 = vmatprep.subr.mxu0 %v54_v44  ;;  %v14_v2 = vld [vmem:[%s848_s0] sm:$0xff]  ;;  %v103_v10 = vld [vmem:[%s847_s1 + $0x228] sm:$0xff]  ;;  %v25_v12 = vld [vmem:[%s848_s0 + $0x58] sm:$0xff] }
  0x1a   :  { %464 = vmatprep.subr.mxu1 %v86_v45  ;;  %421 = vmatpush3.msra.mxu0 %v38_v46  ;;  %v22_v7 = vld [vmem:[%s848_s0 + $0x40] sm:$0xff]  ;;  %v27_v13 = vld [vmem:[%s848_s0 + $0x68] sm:$0xff]  ;;  %v24_v14 = vld [vmem:[%s848_s0 + $0x50] sm:$0xff] }
  0x1b   :  { %465 = vmatpush3.msra.mxu1 %v70_v47  ;;  %422 = vmatprep.subr.mxu0 %v53_v48  ;;  %v102_v11 = vld [vmem:[%s847_s1 + $0x220] sm:$0xff]  ;;  %v101_v16 = vld [vmem:[%s847_s1 + $0x218] sm:$0xff]  ;;  %v100_v17 = vld [vmem:[%s847_s1 + $0x210] sm:$0xff] }
  0x1c   :  { %466 = vmatprep.subr.mxu1 %v85_v49  ;;  %423 = vmatpush3.msra.mxu0 %v37_v50  ;;  %v26_v15 = vld [vmem:[%s848_s0 + $0x60] sm:$0xff]  ;;  %v32_v19 = vld [vmem:[%s848_s0 + $0x90] sm:$0xff]  ;;  %v29_v20 = vld [vmem:[%s848_s0 + $0x78] sm:$0xff] }
  0x1d   :  { %467 = vmatpush3.msra.mxu1 %v69_v51  ;;  %424 = vmatprep.subr.mxu0 %v52_v52  ;;  %v30_v18 = vld [vmem:[%s848_s0 + $0x80] sm:$0xff]  ;;  %v31_v21 = vld [vmem:[%s848_s0 + $0x88] sm:$0xff]  ;;  %v28_v25 = vld [vmem:[%s848_s0 + $0x70] sm:$0xff] }
  0x1e   :  { %468 = vmatprep.subr.mxu1 %v84_v53  ;;  %425 = vmatpush3.msra.mxu0 %v36_v54  ;;  %v99_v22 = vld [vmem:[%s847_s1 + $0x208] sm:$0xff]  ;;  %v98_v23 = vld [vmem:[%s847_s1 + $0x200] sm:$0xff]  ;;  %v33_v27 = vld [vmem:[%s848_s0 + $0x98] sm:$0xff] }
  0x1f   :  { %469 = vmatpush3.msra.mxu1 %v68_v55  ;;  %426 = vmatprep.subr.mxu0 %v51_v56  ;;  %v18_v24 = vld [vmem:[%s848_s0 + $0x20] sm:$0xff]  ;;  %v23_v26 = vld [vmem:[%s848_s0 + $0x48] sm:$0xff] }
  0x20   :  { %470 = vmatprep.subr.mxu1 %v83_v57  ;;  %427 = vmatpush3.msra.mxu0 %v35_v58  ;;  %v393_v43 = vld [vmem:[%s849_s2] ss:$0 sm:$0xff] }
  0x21   :  { %471 = vmatpush3.msra.mxu1 %v67_v59  ;;  %428 = vmatprep.subr.mxu0 %v50_v60 }
  0x22   :  { %472 = vmatprep.subr.mxu1 %v82_v61  ;;  %429 = vmatpush3.msra.mxu0 %v34_v62 }
  0x23   :  { %190 = vmatprep.mubr.f32.mxu0 %v15_v63  ;;  %473 = vmatpush3.msra.mxu1 %v66_v0 }
  0x24   :  { %275 = vmatprep.mubr.f32.mxu1 %v17_v1  ;;  %191 = vmatmul.mubr.f32.vlgmr.msra.gmra.mxu0 %v14_v2 }
  0x25   :  { %276 = vmatmul.mubr.f32.vlgmr.msra.gmra.mxu1 %v16_v3  ;;  %498 = vmatprep.subr.mxu0 %v105_v4 }
  0x26   :  { %520 = vmatprep.subr.mxu1 %v105_v4  ;;  %499 = vmatpush3.msra.mxu0 %v105_v4 }
  0x27   :  { %528 = vmatpush3.msra.mxu1 %v105_v4  ;;  %500 = vmatprep.subr.mxu0 %v104_v5 }
  0x28   :  { %521 = vmatprep.subr.mxu1 %v104_v5  ;;  %195 = vmatprep.mubr.f32.mxu0 %v20_v6 }
  0x29   :  { %280 = vmatprep.mubr.f32.mxu1 %v22_v7  ;;  %501 = vmatpush3.msra.mxu0 %v104_v5 }
  0x2a   :  { %529 = vmatpush3.msra.mxu1 %v104_v5  ;;  %196 = vmatmul.mubr.f32.gmra.mxu0 %v19_v8 }
  0x2b   :  { %281 = vmatmul.mubr.f32.gmra.mxu1 %v21_v9  ;;  %502 = vmatprep.subr.mxu0 %v103_v10 }
  0x2c   :  { %522 = vmatprep.subr.mxu1 %v103_v10  ;;  %503 = vmatpush3.msra.mxu0 %v103_v10 }
  0x2d   :  { %530 = vmatpush3.msra.mxu1 %v103_v10  ;;  %504 = vmatprep.subr.mxu0 %v102_v11 }
  0x2e   :  { %523 = vmatprep.subr.mxu1 %v102_v11  ;;  %200 = vmatprep.mubr.f32.mxu0 %v25_v12 }
  0x2f   :  { %285 = vmatprep.mubr.f32.mxu1 %v27_v13  ;;  %505 = vmatpush3.msra.mxu0 %v102_v11 }
  0x30   :  { %531 = vmatpush3.msra.mxu1 %v102_v11  ;;  %201 = vmatmul.mubr.f32.gmra.mxu0 %v24_v14 }
  0x31   :  { %286 = vmatmul.mubr.f32.gmra.mxu1 %v26_v15  ;;  %506 = vmatprep.subr.mxu0 %v101_v16 }
  0x32   :  { %524 = vmatprep.subr.mxu1 %v101_v16  ;;  %507 = vmatpush3.msra.mxu0 %v101_v16 }
  0x33   :  { %532 = vmatpush3.msra.mxu1 %v101_v16  ;;  %508 = vmatprep.subr.mxu0 %v100_v17 }
  0x34   :  { %525 = vmatprep.subr.mxu1 %v100_v17  ;;  %205 = vmatprep.mubr.f32.mxu0 %v30_v18 }
  0x35   :  { %290 = vmatprep.mubr.f32.mxu1 %v32_v19  ;;  %509 = vmatpush3.msra.mxu0 %v100_v17 }
  0x36   :  { %533 = vmatpush3.msra.mxu1 %v100_v17  ;;  %206 = vmatmul.mubr.f32.gmra.mxu0 %v29_v20 }
  0x37   :  { %291 = vmatmul.mubr.f32.gmra.mxu1 %v31_v21  ;;  %510 = vmatprep.subr.mxu0 %v99_v22 }
  0x38   :  { %526 = vmatprep.subr.mxu1 %v99_v22  ;;  %511 = vmatpush3.msra.mxu0 %v99_v22 }
  0x39   :  { %534 = vmatpush3.msra.mxu1 %v99_v22  ;;  %512 = vmatprep.subr.mxu0 %v98_v23 }
  0x3a   :  { %527 = vmatprep.subr.mxu1 %v98_v23  ;;  %513 = vmatpush3.msra.mxu0 %v98_v23 }
  0x3b   :  { %535 = vmatpush3.msra.mxu1 %v98_v23  ;;  %514 = vmatprep.mubr.msk.f32.mxu0 %vm113_vm0, %v18_v24 }
  0x3c   :  { %517 = vmatprep.mubr.msk.f32.mxu1 %vm113_vm0, %v28_v25  ;;  %515 = vmatmul.mubr.msk.f32.vlgmr.msra.gmra.mxu0 %vm113_vm0, %v23_v26 }
  0x3d   :  { %518 = vmatmul.mubr.msk.f32.vlgmr.msra.gmra.mxu1 %vm113_vm0, %v33_v27 }
  0xe4   :  { %v430_v28 = vpop.f32.mrf.mxu0 }
  0xe5   :  { %v474_v29 = vpop.f32.mrf.mxu1 }
  0xe6   :  { %v431_v30 = vpop.f32.mrf.mxu0 }
  0xe7   :  { %v475_v31 = vpop.f32.mrf.mxu1  ;;  %v432_v41 = vadd.f32 %v431_v30, %v430_v28 }
  0xe8   :  { %v476_v53 = vadd.f32 %v475_v31, %v474_v29 }
  0xe9   :  { %v193_v49 = vadd.f32 %v432_v41, %v393_v43 }
  0xea   :  { %v433_v32 = vpop.f32.mrf.mxu0 }
  0xeb   :  { %v477_v33 = vpop.f32.mrf.mxu1  ;;  %v278_v62 = vadd.f32 %v476_v53, %v193_v49 }
  0xec   :  { %v434_v34 = vpop.f32.mrf.mxu0 }
  0xed   :  { %v478_v35 = vpop.f32.mrf.mxu1  ;;  %v435_v40 = vadd.f32 %v434_v34, %v433_v32 }
  0xee   :  { %v479_v50 = vadd.f32 %v478_v35, %v477_v33 }
  0xef   :  { %v198_v46 = vadd.f32 %v435_v40, %v393_v43 }
  0xf0   :  { %v436_v36 = vpop.f32.mrf.mxu0 }
  0xf1   :  { %v480_v37 = vpop.f32.mrf.mxu1  ;;  %v283_v57 = vadd.f32 %v479_v50, %v198_v46 }
  0xf2   :  { %v437_v38 = vpop.f32.mrf.mxu0 }
  0xf3   :  { %v481_v39 = vpop.f32.mrf.mxu1  ;;  %v438_v42 = vadd.f32 %v437_v38, %v436_v36 }
  0xf4   :  { %v482_v54 = vadd.f32 %v481_v39, %v480_v37 }
  0xf5   :  { %v203_v51 = vadd.f32 %v438_v42, %v393_v43 }
  0xf6   :  { %v439_v44 = vpop.f32.mrf.mxu0 }
  0xf7   :  { %v483_v45 = vpop.f32.mrf.mxu1  ;;  %v288_v63 = vadd.f32 %v482_v54, %v203_v51 }
  0xf8   :  { %v440_v47 = vpop.f32.mrf.mxu0 }
  0xf9   :  { %v484_v48 = vpop.f32.mrf.mxu1  ;;  %v441_v52 = vadd.f32 %v440_v47, %v439_v44 }
  0xfa   :  { %v485_v56 = vadd.f32 %v484_v48, %v483_v45 }
  0xfb   :  { %v208_v55 = vadd.f32 %v441_v52, %v393_v43 }
  0xfc   :  { %v516_v58 = vpop.f32.mrf.mxu0 }
  0xfd   :  { %v519_v59 = vpop.f32.mrf.mxu1  ;;  %v368_v60 = vadd.f32 %v516_v58, %v283_v57  ;;  %v293_v61 = vadd.f32 %v485_v56, %v208_v55 }
  0xfe   :  { %v362_v0 = vpop.f32.mrf.mxu0 }
  0xff   :  { %v372_v1 = vpop.f32.mrf.mxu1  ;;  %v382_v2 = vmax.f32 %v368_v60, 0.0  ;;  %v378_v3 = vadd.f32 %v519_v59, %v293_v61  ;;  %v363_v4 = vadd.f32 %v362_v0, %v278_v62 }
 0x100   :  { %v373_v5 = vadd.f32 %v372_v1, %v288_v63 }
 0x101   :  { %386 = vst [vmem:[%s850_s3 + $0x8] sm:$0xff] %v382_v2  ;;  %v384_v6 = vmax.f32 %v378_v3, 0.0  ;;  %v381_v7 = vmax.f32 %v363_v4, 0.0 }
 0x102   :  { %v383_v8 = vmax.f32 %v373_v5, 0.0 }
 0x103   :  { %388 = vst [vmem:[%s850_s3 + $0x18] sm:$0xff] %v384_v6  ;;  %385 = vst [vmem:[%s850_s3] sm:$0xff] %v381_v7 }
 0x104   :  { %387 = vst [vmem:[%s850_s3 + $0x10] sm:$0xff] %v383_v8 }

</bundles_post_ra>
